<compile_context>
chip_gen: v5e
topology: v5e:2x2
jax: 0.10.0
libtpu: 0.0.40
codegen_flags: <defaults>
</compile_context>

<pallas_src>
import jax
import jax.numpy as jnp
from jax import lax
from jax.experimental import pallas as pl
from jax.experimental.pallas import tpu as pltpu

_LANE = 128
_SUB = 8
_TM_MAX = 2048  # sublane rows per grid step: 3 * 2048 * 128 * 4 B = 3 MiB / input buffer

# rgb -> yuv matrix (kornia coefficients, as used by videoseal's rgb_to_yuv).
_M = (
    (0.299, 0.587, 0.114),
    (-0.147, -0.289, 0.436),
    (0.615, -0.515, -0.100),
)
# W = M^T M : the loss is the quadratic form ||M (x - y)||^2 = d^T W d.
_W = tuple(
    tuple(sum(_M[k][i] * _M[k][j] for k in range(3)) for j in range(3))
    for i in range(3)
)


def _make_kernel(nlanes, tm, nj):
    """Kernel over (G, 3, tm, 128) RGB difference tiles."""
    needs_mask = (nlanes % tm) != 0

    w00, w01, w02 = _W[0]
    w11, w12 = _W[1][1], _W[1][2]
    w22 = _W[2][2]
    # Fold the factor of 2 on the off-diagonal terms into the constants.
    c01, c02, c12 = 2.0 * w01, 2.0 * w02, 2.0 * w12

    def accumulate(x_ref, y_ref, o_ref, *, mask_tail):
        j = pl.program_id(1)

        # (G, 3, tm, 128) difference in f32 (inputs may be bf16 on the wire).
        d = x_ref[...].astype(jnp.float32) - y_ref[...].astype(jnp.float32)

        if mask_tail:
            # Only the last j-step reaches past nlanes: zero the invalid rows
            # of the diff itself so OOB garbage contributes exactly nothing.
            rows_valid = nlanes - j * tm
            row = lax.broadcasted_iota(jnp.int32, d.shape, 2)
            d = jnp.where(row < rows_valid, d, 0.0)

        dr = d[:, 0]
        dg = d[:, 1]
        db = d[:, 2]

        # Factored quadratic form d^T W d (== dy^2 + du^2 + dv^2):
        #   9 muls + 5 adds per pixel.
        sq = (dr * (w00 * dr + c01 * dg + c02 * db)
              + dg * (w11 * dg + c12 * db)
              + db * (w22 * db))  # (G, tm, 128)

        g = sq.shape[0]
        # Fold into one (8,128) vreg: split the sublane dim at vreg boundaries
        # (no-copy reshape) and reduce the leading, untiled dims (vreg adds).
        acc = sq.reshape(g, tm // _SUB, _SUB, _LANE).sum(axis=0).sum(axis=0)
        o_ref[0] += acc

    def kernel(x_ref, y_ref, o_ref):
        j = pl.program_id(1)

        # New batch-group => new accumulator block: zero on its first j-step.
        @pl.when(j == 0)
        def _():
            o_ref[...] = jnp.zeros_like(o_ref)

        if needs_mask:
            last = nj - 1

            @pl.when(j == last)
            def _():
                accumulate(x_ref, y_ref, o_ref, mask_tail=True)

            @pl.when(j < last)
            def _():
                accumulate(x_ref, y_ref, o_ref, mask_tail=False)
        else:
            accumulate(x_ref, y_ref, o_ref, mask_tail=False)

    return kernel


def yuv_loss(x, y):
    """MSE(rgb_to_yuv(x), rgb_to_yuv(y)) for NCHW inputs with C == 3."""
    B, C, H, W = x.shape
    assert C == 3, "YUVLoss expects 3-channel RGB inputs"
    assert x.shape == y.shape
    HW = H * W

    # Flatten pixels per channel (free, contiguous reshape).  Pad the pixel
    # axis to a multiple of 128 lanes and to at least one full (8,128) vreg;
    # padded pixels are zero in BOTH inputs so they contribute exactly zero.
    hw_pad = max(-(-HW // _LANE) * _LANE, _SUB * _LANE)
    pad = hw_pad - HW
    xf = x.reshape(B, 3, HW)
    yf = y.reshape(B, 3, HW)
    if pad:
        xf = jnp.pad(xf, ((0, 0), (0, 0), (0, pad)))
        yf = jnp.pad(yf, ((0, 0), (0, 0), (0, pad)))
    nlanes = hw_pad // _LANE

    x4 = xf.reshape(B, 3, nlanes, _LANE)
    y4 = yf.reshape(B, 3, nlanes, _LANE)

    # Tile height: a multiple of 8 sublanes, <= nlanes, capped at _TM_MAX.
    tm = min(_TM_MAX, (nlanes // _SUB) * _SUB)
    nj = -(-nlanes // tm)

    # Small-image regime: group G images per grid step (G divides B, and
    # G*tm <= _TM_MAX rows/step) to amortize the ~0.35 us per-step overhead.
    max_g = max(1, _TM_MAX // tm)
    g = 1
    for cand in range(min(B, max_g), 0, -1):
        if B % cand == 0:
            g = cand
            break
    nb = B // g
    grid = (nb, nj)

    itemsize = jnp.dtype(x.dtype).itemsize
    cost = pl.CostEstimate(
        flops=20 * B * HW,
        transcendentals=0,
        bytes_accessed=2 * 3 * B * nlanes * _LANE * itemsize
        + nb * _SUB * _LANE * 4,
    )

    partial = pl.pallas_call(
        _make_kernel(nlanes, tm, nj),
        out_shape=jax.ShapeDtypeStruct((nb, _SUB, _LANE), jnp.float32),
        grid=grid,
        in_specs=[
            pl.BlockSpec((g, 3, tm, _LANE), lambda b, j: (b, 0, j, 0)),
            pl.BlockSpec((g, 3, tm, _LANE), lambda b, j: (b, 0, j, 0)),
        ],
        # One resident (8,128) accumulator per batch-group: revisited across
        # the (arbitrary) pixel-slab axis, independent across the (parallel)
        # batch axis -> v7x megacore can split groups across TensorCores.
        out_specs=pl.BlockSpec((1, _SUB, _LANE), lambda b, j: (b, 0, 0)),
        compiler_params=pltpu.CompilerParams(
            dimension_semantics=("parallel", "arbitrary"),
            vmem_limit_bytes=32 * 1024 * 1024,
        ),
        cost_estimate=cost,
    )(x4, y4)

    # MSELoss(reduction='mean'): divide by total number of YUV elements.
    return jnp.sum(partial) / jnp.float32(3 * B * HW)


yuv_loss = jax.jit(yuv_loss)


def _rgb_to_yuv_ref(img):
    r, g, b = img[:, 0], img[:, 1], img[:, 2]
    y = 0.299 * r + 0.587 * g + 0.114 * b
    u = -0.147 * r - 0.289 * g + 0.436 * b
    v = 0.615 * r - 0.515 * g - 0.100 * b
    return jnp.stack([y, u, v], axis=1)


if __name__ == "__main__":
    key = jax.random.PRNGKey(0)
    kx, ky = jax.random.split(key)
    # Small NCHW RGB images, like the PyTorch module would receive.
    # (preprocess defaults to identity in the PyTorch module.)
    x = jax.random.uniform(kx, (2, 3, 16, 16), dtype=jnp.float32)
    y = jax.random.uniform(ky, (2, 3, 16, 16), dtype=jnp.float32)

    loss = yuv_loss(x, y)
    loss = jax.block_until_ready(loss)

    # Pure-JAX reference (convert both images to YUV, then mean-MSE).
    ref = jnp.mean((_rgb_to_yuv_ref(x) - _rgb_to_yuv_ref(y)) ** 2)
    assert jnp.allclose(loss, ref, rtol=1e-4, atol=1e-6), (loss, ref)

    # Also exercise a larger, tail-masked shape (nlanes not a multiple of tm).
    x2 = jax.random.uniform(kx, (2, 3, 96, 96), dtype=jnp.float32)
    y2 = jax.random.uniform(ky, (2, 3, 96, 96), dtype=jnp.float32)
    loss2 = jax.block_until_ready(yuv_loss(x2, y2))
    ref2 = jnp.mean((_rgb_to_yuv_ref(x2) - _rgb_to_yuv_ref(y2)) ** 2)
    assert jnp.allclose(loss2, ref2, rtol=1e-4, atol=1e-6), (loss2, ref2)

    print("KERNEL_OK")
</pallas_src>

<mosaic_0001>
module attributes {stable_mosaic.version = 11 : i64} {
  func.func @kernel(%arg0: i32, %arg1: i32, %arg2: memref<2x3x8x128xf32, #tpu.memory_space<vmem>>, %arg3: memref<2x3x8x128xf32, #tpu.memory_space<vmem>>, %arg4: memref<1x8x128xf32, #tpu.memory_space<vmem>>) attributes {dimension_semantics = [#tpu.dimension_semantics<parallel>, #tpu.dimension_semantics<arbitrary>], iteration_bounds = array<i64: 1, 1>, scalar_prefetch = 0 : i64, scratch_operands = 0 : i64, tpu.core_type = #tpu.core_type<tc>, window_params = [{transform_indices = @transform_0, window_bounds = array<i64: 2, 3, 8, 128>}, {transform_indices = @transform_1, window_bounds = array<i64: 2, 3, 8, 128>}, {transform_indices = @transform_2, window_bounds = array<i64: 1, 8, 128>}]} {
    %c0_i32 = arith.constant 0 : i32
    %0 = arith.cmpi eq, %arg1, %c0_i32 : i32
    %1 = arith.extui %0 : i1 to i32
    %c0_i32_0 = arith.constant 0 : i32
    %2 = arith.cmpi ne, %1, %c0_i32_0 : i32
    scf.if %2 {
      %cst_21 = arith.constant 0.000000e+00 : f32
      %41 = vector.broadcast %cst_21 : f32 to vector<1x8x128xf32>
      %c0_22 = arith.constant 0 : index
      %c0_23 = arith.constant 0 : index
      %c0_24 = arith.constant 0 : index
      %42 = vector.load %arg4[%c0_22, %c0_23, %c0_24] : memref<1x8x128xf32, #tpu.memory_space<vmem>>, vector<1x8x128xf32>
      tpu.vector_store %arg4[%c0_22, %c0_23, %c0_24], %41 {strides = array<i32>} : memref<1x8x128xf32, #tpu.memory_space<vmem>>, vector<1x8x128xf32>,
    } else {
    }
    %c0 = arith.constant 0 : index
    %c0_1 = arith.constant 0 : index
    %c0_2 = arith.constant 0 : index
    %c0_3 = arith.constant 0 : index
    %3 = vector.load %arg2[%c0, %c0_1, %c0_2, %c0_3] : memref<2x3x8x128xf32, #tpu.memory_space<vmem>>, vector<2x3x8x128xf32>
    %c0_4 = arith.constant 0 : index
    %c0_5 = arith.constant 0 : index
    %c0_6 = arith.constant 0 : index
    %c0_7 = arith.constant 0 : index
    %4 = vector.load %arg3[%c0_4, %c0_5, %c0_6, %c0_7] : memref<2x3x8x128xf32, #tpu.memory_space<vmem>>, vector<2x3x8x128xf32>
    %5 = arith.subf %3, %4 : vector<2x3x8x128xf32>
    %6 = vector.extract_strided_slice %5 {offsets = [0, 0, 0, 0], sizes = [2, 1, 8, 128], strides = [1, 1, 1, 1]} : vector<2x3x8x128xf32> to vector<2x1x8x128xf32>
    %7 = vector.shape_cast %6 : vector<2x1x8x128xf32> to vector<2x8x128xf32>
    %8 = vector.extract_strided_slice %5 {offsets = [0, 1, 0, 0], sizes = [2, 1, 8, 128], strides = [1, 1, 1, 1]} : vector<2x3x8x128xf32> to vector<2x1x8x128xf32>
    %9 = vector.shape_cast %8 : vector<2x1x8x128xf32> to vector<2x8x128xf32>
    %10 = vector.extract_strided_slice %5 {offsets = [0, 2, 0, 0], sizes = [2, 1, 8, 128], strides = [1, 1, 1, 1]} : vector<2x3x8x128xf32> to vector<2x1x8x128xf32>
    %11 = vector.shape_cast %10 : vector<2x1x8x128xf32> to vector<2x8x128xf32>
    %cst = arith.constant 4.892350e-01 : f32
    %12 = vector.broadcast %cst : f32 to vector<2x8x128xf32>
    %13 = arith.mulf %12, %7 : vector<2x8x128xf32>
    %cst_8 = arith.constant -1.974580e-01 : f32
    %14 = vector.broadcast %cst_8 : f32 to vector<2x8x128xf32>
    %15 = arith.mulf %14, %9 : vector<2x8x128xf32>
    %16 = arith.addf %13, %15 : vector<2x8x128xf32>
    %cst_9 = arith.constant -1.830120e-01 : f32
    %17 = vector.broadcast %cst_9 : f32 to vector<2x8x128xf32>
    %18 = arith.mulf %17, %11 : vector<2x8x128xf32>
    %19 = arith.addf %16, %18 : vector<2x8x128xf32>
    %20 = arith.mulf %7, %19 : vector<2x8x128xf32>
    %cst_10 = arith.constant 6.933150e-01 : f32
    %21 = vector.broadcast %cst_10 : f32 to vector<2x8x128xf32>
    %22 = arith.mulf %21, %9 : vector<2x8x128xf32>
    %cst_11 = arith.constant -1.517200e-02 : f32
    %23 = vector.broadcast %cst_11 : f32 to vector<2x8x128xf32>
    %24 = arith.mulf %23, %11 : vector<2x8x128xf32>
    %25 = arith.addf %22, %24 : vector<2x8x128xf32>
    %26 = arith.mulf %9, %25 : vector<2x8x128xf32>
    %27 = arith.addf %20, %26 : vector<2x8x128xf32>
    %cst_12 = arith.constant 2.130920e-01 : f32
    %28 = vector.broadcast %cst_12 : f32 to vector<2x8x128xf32>
    %29 = arith.mulf %28, %11 : vector<2x8x128xf32>
    %30 = arith.mulf %11, %29 : vector<2x8x128xf32>
    %31 = arith.addf %27, %30 : vector<2x8x128xf32>
    %32 = vector.shape_cast %31 : vector<2x8x128xf32> to vector<2x1x8x128xf32>
    %cst_13 = arith.constant dense<0.000000e+00> : vector<1x8x128xf32>
    %33 = vector.multi_reduction <add>, %32, %cst_13 [0] : vector<2x1x8x128xf32> to vector<1x8x128xf32>
    %cst_14 = arith.constant dense<0.000000e+00> : vector<8x128xf32>
    %34 = vector.multi_reduction <add>, %33, %cst_14 [0] : vector<1x8x128xf32> to vector<8x128xf32>
    %c0_15 = arith.constant 0 : index
    %c0_16 = arith.constant 0 : index
    %c0_17 = arith.constant 0 : index
    %35 = vector.load %arg4[%c0_15, %c0_16, %c0_17] : memref<1x8x128xf32, #tpu.memory_space<vmem>>, vector<1x8x128xf32>
    %36 = vector.shape_cast %35 : vector<1x8x128xf32> to vector<8x128xf32>
    %37 = arith.addf %36, %34 : vector<8x128xf32>
    %c0_18 = arith.constant 0 : index
    %c0_19 = arith.constant 0 : index
    %c0_20 = arith.constant 0 : index
    %38 = vector.load %arg4[%c0_18, %c0_19, %c0_20] : memref<1x8x128xf32, #tpu.memory_space<vmem>>, vector<1x8x128xf32>
    %39 = vector.shape_cast %38 : vector<1x8x128xf32> to vector<8x128xf32>
    %40 = vector.shape_cast %37 : vector<8x128xf32> to vector<1x8x128xf32>
    tpu.vector_store %arg4[%c0_18, %c0_19, %c0_20], %40 {strides = array<i32>} : memref<1x8x128xf32, #tpu.memory_space<vmem>>, vector<1x8x128xf32>,
    return
  }
  func.func @transform_0(%arg0: i32, %arg1: i32) -> (i32, i32, i32, i32) {
    %c0_i32 = arith.constant 0 : i32
    %c0_i32_0 = arith.constant 0 : i32
    %c0_i32_1 = arith.constant 0 : i32
    return %arg0, %c0_i32, %arg1, %c0_i32_0 : i32, i32, i32, i32
  }
  func.func @transform_1(%arg0: i32, %arg1: i32) -> (i32, i32, i32, i32) {
    %c0_i32 = arith.constant 0 : i32
    %c0_i32_0 = arith.constant 0 : i32
    %c0_i32_1 = arith.constant 0 : i32
    return %arg0, %c0_i32, %arg1, %c0_i32_0 : i32, i32, i32, i32
  }
  func.func @transform_2(%arg0: i32, %arg1: i32) -> (i32, i32, i32) {
    %c0_i32 = arith.constant 0 : i32
    %c0_i32_0 = arith.constant 0 : i32
    %c0_i32_1 = arith.constant 0 : i32
    return %arg0, %c0_i32, %c0_i32_0 : i32, i32, i32
  }
}

</mosaic_0001>

<bundles_post_ra>
// kernel: yuv_loss.1
= control target key start
LH: loop header
LB: loop body
LE: loop exit
PB: predicated region body
PF: predicated region fallthrough
CT: control target
= control target key end

     0   :  { %s126_s0 = inlined_call_operand.vmem [shape: f32[2,3,8,128], index: 0, kind: input, shape index: {}]   ;;  %s127_s1 = inlined_call_operand.vmem [shape: f32[2,3,8,128], index: 1, kind: input, shape index: {}]   ;;  %s128_s2 = inlined_call_operand.vmem [shape: f32[1,8,128], index: 2, kind: output, shape index: {}]  }
   0x1   :  { %v16_v0 = vld [vmem:[%s126_s0] sm:$0xff]  ;;  %v17_v1 = vld [vmem:[%s126_s0 + $0x8] sm:$0xff]  ;;  %v18_v2 = vld [vmem:[%s126_s0 + $0x10] sm:$0xff] }
   0x2   :  { %v19_v3 = vld [vmem:[%s126_s0 + $0x18] sm:$0xff]  ;;  %v20_v4 = vld [vmem:[%s126_s0 + $0x20] sm:$0xff]  ;;  %v21_v5 = vld [vmem:[%s126_s0 + $0x28] sm:$0xff] }
   0x3   :  { %v22_v6 = vld [vmem:[%s127_s1] sm:$0xff]  ;;  %v23_v7 = vld [vmem:[%s127_s1 + $0x8] sm:$0xff]  ;;  %v24_v8 = vld [vmem:[%s127_s1 + $0x10] sm:$0xff] }
   0x4   :  { %v25_v9 = vld [vmem:[%s127_s1 + $0x18] sm:$0xff]  ;;  %v26_v10 = vld [vmem:[%s127_s1 + $0x20] sm:$0xff]  ;;  %v27_v11 = vld [vmem:[%s127_s1 + $0x28] sm:$0xff]  ;;  %v28_v12 = vsub.f32 %v16_v0, %v22_v6  ;;  %v29_v13 = vsub.f32 %v17_v1, %v23_v7  ;;  %v30_v14 = vsub.f32 %v18_v2, %v24_v8 }
   0x5   :  { %v31_v15 = vsub.f32 %v19_v3, %v25_v9  ;;  %v32_v16 = vsub.f32 %v20_v4, %v26_v10  ;;  %v33_v17 = vsub.f32 %v21_v5, %v27_v11 }
   0x6   :  { %v34_v18 = vmul.f32 0.489235, %v28_v12  ;;  %v36_v19 = vmul.f32 -0.197458, %v29_v13  ;;  %v40_v20 = vmul.f32 -0.183012, %v30_v14 }
   0x7   :  { %v35_v21 = vmul.f32 0.489235, %v31_v15  ;;  %v37_v22 = vmul.f32 -0.197458, %v32_v16  ;;  %v41_v23 = vmul.f32 -0.183012, %v33_v17 }
   0x8   :  { %v38_v24 = vadd.f32 %v36_v19, %v34_v18  ;;  %v46_v25 = vmul.f32 0.693315, %v29_v13  ;;  %v47_v26 = vmul.f32 0.693315, %v32_v16  ;;  %v48_v27 = vmul.f32 -0.015172, %v30_v14 }
   0x9   :  { %v39_v28 = vadd.f32 %v37_v22, %v35_v21  ;;  %v49_v29 = vmul.f32 -0.015172, %v33_v17  ;;  %v56_v30 = vmul.f32 0.213092, %v30_v14  ;;  %v57_v31 = vmul.f32 0.213092, %v33_v17 }
   0xa   :  { %v42_v32 = vadd.f32 %v40_v20, %v38_v24  ;;  %v50_v33 = vadd.f32 %v48_v27, %v46_v25 }
   0xb   :  { %v43_v34 = vadd.f32 %v41_v23, %v39_v28  ;;  %v51_v35 = vadd.f32 %v49_v29, %v47_v26  ;;  %v58_v38 = vmul.f32 %v56_v30, %v30_v14  ;;  %v59_v41 = vmul.f32 %v57_v31, %v33_v17 }
   0xc   :  { %v44_v36 = vmul.f32 %v42_v32, %v28_v12  ;;  %v52_v37 = vmul.f32 %v50_v33, %v29_v13 }
   0xd   :  { %v45_v39 = vmul.f32 %v43_v34, %v31_v15  ;;  %v53_v40 = vmul.f32 %v51_v35, %v32_v16 }
   0xe   :  { %v54_v42 = vadd.f32 %v52_v37, %v44_v36 }
   0xf   :  { %v55_v43 = vadd.f32 %v53_v40, %v45_v39 }
  0x10   :  { %v60_v44 = vadd.f32 %v58_v38, %v54_v42 }
  0x11   :  { %v61_v45 = vadd.f32 %v59_v41, %v55_v43 }
  0x13   :  { %v62_v46 = vadd.f32 %v61_v45, %v60_v44 }
  0x15   :  { %66 = vst [vmem:[%s128_s2] sm:$0xff] %v62_v46 }

</bundles_post_ra>
